<compile_context>
chip_gen: v5e
topology: v5e:2x2
jax: 0.10.0
libtpu: 0.0.40
codegen_flags: <defaults>
</compile_context>

<pallas_src>
import functools
import numpy as np
import jax
import jax.numpy as jnp
from jax.experimental import pallas as pl
from jax.experimental.pallas import tpu as pltpu

HIDDEN = 64          # matches `hidden = 64` in the PyTorch module
M_ALIGN = 16         # bf16-friendly sublane multiple for the batch (row) axis
M_TILE_MAX = 512     # batch tile size for large batches


def _round_up(n, m):
    return -(-n // m) * m


# ----------------------------- Pallas kernel ---------------------------------
def _mlp_head_kernel(x_ref,                  # (tm, input_dim)   bf16
                     w1_ref, b1_ref,         # (input_dim, 64) bf16, (1, 64) f32
                     ws_ref, bs_ref,         # (3, 64, 64) bf16,    (3, 1, 64) f32
                     wf_ref, bf_ref,         # (64, out) bf16,      (1, out) f32  (layer5⊗head fused)
                     out_ref):               # (tm, out) f32
    # layer 1: Linear(input_dim, 64) + ReLU   (f32 accumulation)
    h = jnp.dot(x_ref[...], w1_ref[...], preferred_element_type=jnp.float32) + b1_ref[...]
    h = jnp.maximum(h, 0.0)
    # layers 2..4: Linear(64, 64) + ReLU
    for k in range(3):
        h = jnp.dot(h.astype(jnp.bfloat16), ws_ref[k],
                    preferred_element_type=jnp.float32) + bs_ref[k]
        h = jnp.maximum(h, 0.0)
    # layer 5 (no ReLU) fused with the theta head: exact since both are linear
    out_ref[...] = (jnp.dot(h.astype(jnp.bfloat16), wf_ref[...],
                            preferred_element_type=jnp.float32)
                    + bf_ref[...]).astype(out_ref.dtype)


# ------------------------ one-time parameter re-layout ------------------------
def prepare_base_params(base_params):
    """Re-layout the (static) base network once:
    PyTorch (out,in) W -> (in,out), b -> (1,out); layers 2..4 stacked; layer 5 kept
    in f32 so it can be fused exactly with the per-call head weights."""
    (w1, b1) = base_params[0]
    w1_bf = jnp.asarray(w1, jnp.float32).T.astype(jnp.bfloat16)          # (input_dim, 64)
    b1_r = jnp.asarray(b1, jnp.float32).reshape(1, HIDDEN)               # (1, 64) f32
    ws_bf = jnp.stack([jnp.asarray(w, jnp.float32).T
                       for (w, _) in base_params[1:4]]).astype(jnp.bfloat16)   # (3, 64, 64)
    bs_r = jnp.stack([jnp.asarray(b, jnp.float32).reshape(1, HIDDEN)
                      for (_, b) in base_params[1:4]])                   # (3, 1, 64) f32
    (w5, b5) = base_params[4]
    w5_t = jnp.asarray(w5, jnp.float32).T                                # (64, 64) f32 (for fusion)
    b5_r = jnp.asarray(b5, jnp.float32).reshape(1, HIDDEN)               # (1, 64) f32
    return w1_bf, b1_r, ws_bf, bs_r, w5_t, b5_r


# ------------------------------ Python wrapper --------------------------------
@functools.partial(jax.jit, static_argnums=(3,))
def main_network_head_forward(x, prepared_base, theta_vec, output_dim):
    """MainNetwork.forward(x, theta) for adaptation='head', feature_extractor='nn'."""
    w1_bf, b1, ws_bf, bs, w5_t, b5 = prepared_base
    batch, input_dim = x.shape

    # vec_to_param for the head layer (same splitting as the PyTorch code), then
    # re-layout to (in, out) and fuse hidden layer 5 into it (exact: both linear).
    n_w = output_dim * HIDDEN
    head_w_t = theta_vec[:n_w].reshape(output_dim, HIDDEN).T             # (64, out) f32
    head_b = theta_vec[n_w:n_w + output_dim].reshape(1, output_dim)      # (1, out) f32
    w_fused = (w5_t @ head_w_t).astype(jnp.bfloat16)                     # (64, out) bf16
    b_fused = b5 @ head_w_t + head_b                                     # (1, out) f32

    # Batch tiling: tm up to 512 rows, aligned to 16 (bf16 sublane packing).
    tm = min(M_TILE_MAX, _round_up(batch, M_ALIGN))
    m_pad = _round_up(batch, tm)

    x_bf = x.astype(jnp.bfloat16)
    if m_pad != batch:
        x_bf = jnp.pad(x_bf, ((0, m_pad - batch), (0, 0)))               # single XLA pad op

    flops = 2 * m_pad * (input_dim * HIDDEN + 3 * HIDDEN * HIDDEN + HIDDEN * output_dim)
    bytes_accessed = (m_pad * input_dim * 2 + m_pad * output_dim * 4
                      + (w1_bf.size + ws_bf.size + w_fused.size) * 2
                      + (b1.size + bs.size + b_fused.size) * 4)

    out = pl.pallas_call(
        _mlp_head_kernel,
        out_shape=jax.ShapeDtypeStruct((m_pad, output_dim), jnp.float32),
        grid=(m_pad // tm,),
        in_specs=[
            pl.BlockSpec((tm, input_dim), lambda i: (i, 0)),             # x: blocked over batch
            pl.BlockSpec((input_dim, HIDDEN), lambda i: (0, 0)),         # resident weights
            pl.BlockSpec((1, HIDDEN), lambda i: (0, 0)),
            pl.BlockSpec((3, HIDDEN, HIDDEN), lambda i: (0, 0, 0)),
            pl.BlockSpec((3, 1, HIDDEN), lambda i: (0, 0, 0)),
            pl.BlockSpec((HIDDEN, output_dim), lambda i: (0, 0)),
            pl.BlockSpec((1, output_dim), lambda i: (0, 0)),
        ],
        out_specs=pl.BlockSpec((tm, output_dim), lambda i: (i, 0)),
        compiler_params=pltpu.CompilerParams(dimension_semantics=("parallel",)),
        cost_estimate=pl.CostEstimate(flops=flops, transcendentals=0,
                                      bytes_accessed=bytes_accessed),
    )(x_bf, w1_bf, b1, ws_bf, bs, w_fused, b_fused)

    return out[:batch]


# ------------------------ deterministic parameter init -----------------------
def _init_linear(key, in_dim, out_dim):
    """PyTorch-style nn.Linear init (uniform +/- 1/sqrt(fan_in)), deterministic."""
    kw, kb = jax.random.split(key)
    bound = 1.0 / np.sqrt(in_dim)
    w = jax.random.uniform(kw, (out_dim, in_dim), jnp.float32, -bound, bound)
    b = jax.random.uniform(kb, (out_dim,), jnp.float32, -bound, bound)
    return w, b


def make_params(key, input_dim, output_dim):
    keys = jax.random.split(key, 7)
    dims = [(input_dim, HIDDEN)] + [(HIDDEN, HIDDEN)] * 4
    base_params = [_init_linear(keys[i], d_in, d_out) for i, (d_in, d_out) in enumerate(dims)]
    # MainNetwork.initialization: param_to_vec of the output layer
    hw, hb = _init_linear(keys[5], HIDDEN, output_dim)
    theta_vec = jnp.concatenate([hw.reshape(-1), hb.reshape(-1)])
    return base_params, theta_vec


# --------------------------------- reference ----------------------------------
def _reference(x, base_params, theta_vec, output_dim):
    n_w = output_dim * HIDDEN
    hw = theta_vec[:n_w].reshape(output_dim, HIDDEN)
    hb = theta_vec[n_w:n_w + output_dim]
    h = x
    for i, (w, b) in enumerate(base_params):
        h = h @ w.T + b
        if i < len(base_params) - 1:
            h = jnp.maximum(h, 0.0)
    return h @ hw.T + hb


# ----------------------------------- main --------------------------------------
if __name__ == "__main__":
    key = jax.random.PRNGKey(0)
    k_x, k_p = jax.random.split(key)

    batch, input_dim, output_dim = 8, 16, 4   # context_dim unused for adaptation='head'

    x = jax.random.normal(k_x, (batch, input_dim), jnp.float32)
    base_params, theta_vec = make_params(k_p, input_dim, output_dim)

    # one-time re-layout of the static base network (hoisted out of the per-call path)
    prepared_base = prepare_base_params(base_params)

    y = main_network_head_forward(x, prepared_base, theta_vec, output_dim)
    y = jax.block_until_ready(y)

    y_ref = _reference(x, base_params, theta_vec, output_dim)
    # bf16 MXU operands (f32 accumulation) -> relaxed tolerance vs. the f32 reference
    np.testing.assert_allclose(np.asarray(y), np.asarray(y_ref), rtol=2e-2, atol=2e-2)

    print("KERNEL_OK")
</pallas_src>

<mosaic_0001>
module attributes {stable_mosaic.version = 11 : i64} {
  func.func @_mlp_head_kernel(%arg0: i32, %arg1: memref<16x16xbf16, #tpu.memory_space<vmem>>, %arg2: memref<16x64xbf16, #tpu.memory_space<vmem>>, %arg3: memref<1x64xf32, #tpu.memory_space<vmem>>, %arg4: memref<3x64x64xbf16, #tpu.memory_space<vmem>>, %arg5: memref<3x1x64xf32, #tpu.memory_space<vmem>>, %arg6: memref<64x4xbf16, #tpu.memory_space<vmem>>, %arg7: memref<1x4xf32, #tpu.memory_space<vmem>>, %arg8: memref<16x4xf32, #tpu.memory_space<vmem>>) attributes {dimension_semantics = [#tpu.dimension_semantics<parallel>], iteration_bounds = array<i64: 1>, scalar_prefetch = 0 : i64, scratch_operands = 0 : i64, tpu.core_type = #tpu.core_type<tc>, window_params = [{transform_indices = @transform_0, window_bounds = array<i64: 16, 16>}, {pipeline_mode = #tpu.pipeline_mode<synchronous>, transform_indices = @transform_1, window_bounds = array<i64: 16, 64>}, {pipeline_mode = #tpu.pipeline_mode<synchronous>, transform_indices = @transform_2, window_bounds = array<i64: 1, 64>}, {pipeline_mode = #tpu.pipeline_mode<synchronous>, transform_indices = @transform_3, window_bounds = array<i64: 3, 64, 64>}, {pipeline_mode = #tpu.pipeline_mode<synchronous>, transform_indices = @transform_4, window_bounds = array<i64: 3, 1, 64>}, {pipeline_mode = #tpu.pipeline_mode<synchronous>, transform_indices = @transform_5, window_bounds = array<i64: 64, 4>}, {pipeline_mode = #tpu.pipeline_mode<synchronous>, transform_indices = @transform_6, window_bounds = array<i64: 1, 4>}, {transform_indices = @transform_7, window_bounds = array<i64: 16, 4>}]} {
    %c0 = arith.constant 0 : index
    %c0_0 = arith.constant 0 : index
    %0 = vector.load %arg1[%c0, %c0_0] : memref<16x16xbf16, #tpu.memory_space<vmem>>, vector<16x16xbf16>
    %c0_1 = arith.constant 0 : index
    %c0_2 = arith.constant 0 : index
    %1 = vector.load %arg2[%c0_1, %c0_2] : memref<16x64xbf16, #tpu.memory_space<vmem>>, vector<16x64xbf16>
    %cst = arith.constant dense<0.000000e+00> : vector<16x64xf32>
    %2 = tpu.matmul %0, %1, %cst {dimension_numbers = #tpu.dot_dimension_numbers<[1], [0], [0], [1], [0, 0, 1, 1], [], []>} : vector<16x16xbf16>, vector<16x64xbf16>, vector<16x64xf32> -> vector<16x64xf32>
    %c0_3 = arith.constant 0 : index
    %c0_4 = arith.constant 0 : index
    %3 = vector.load %arg3[%c0_3, %c0_4] : memref<1x64xf32, #tpu.memory_space<vmem>>, vector<1x64xf32>
    %4 = vector.broadcast %3 : vector<1x64xf32> to vector<16x64xf32>
    %5 = arith.addf %2, %4 : vector<16x64xf32>
    %cst_5 = arith.constant 0.000000e+00 : f32
    %6 = vector.broadcast %cst_5 : f32 to vector<16x64xf32>
    %7 = arith.maximumf %5, %6 : vector<16x64xf32>
    %8 = arith.truncf %7 : vector<16x64xf32> to vector<16x64xbf16>
    %c0_6 = arith.constant 0 : index
    %c0_7 = arith.constant 0 : index
    %c0_8 = arith.constant 0 : index
    %9 = vector.load %arg4[%c0_6, %c0_7, %c0_8] : memref<3x64x64xbf16, #tpu.memory_space<vmem>>, vector<1x64x64xbf16>
    %10 = vector.shape_cast %9 : vector<1x64x64xbf16> to vector<64x64xbf16>
    %cst_9 = arith.constant dense<0.000000e+00> : vector<16x64xf32>
    %11 = tpu.matmul %8, %10, %cst_9 {dimension_numbers = #tpu.dot_dimension_numbers<[1], [0], [0], [1], [0, 0, 1, 1], [], []>} : vector<16x64xbf16>, vector<64x64xbf16>, vector<16x64xf32> -> vector<16x64xf32>
    %c0_10 = arith.constant 0 : index
    %c0_11 = arith.constant 0 : index
    %c0_12 = arith.constant 0 : index
    %12 = vector.load %arg5[%c0_10, %c0_11, %c0_12] : memref<3x1x64xf32, #tpu.memory_space<vmem>>, vector<1x1x64xf32>
    %13 = vector.shape_cast %12 : vector<1x1x64xf32> to vector<1x64xf32>
    %14 = vector.broadcast %13 : vector<1x64xf32> to vector<16x64xf32>
    %15 = arith.addf %11, %14 : vector<16x64xf32>
    %cst_13 = arith.constant 0.000000e+00 : f32
    %16 = vector.broadcast %cst_13 : f32 to vector<16x64xf32>
    %17 = arith.maximumf %15, %16 : vector<16x64xf32>
    %18 = arith.truncf %17 : vector<16x64xf32> to vector<16x64xbf16>
    %c1 = arith.constant 1 : index
    %c0_14 = arith.constant 0 : index
    %c0_15 = arith.constant 0 : index
    %19 = vector.load %arg4[%c1, %c0_14, %c0_15] : memref<3x64x64xbf16, #tpu.memory_space<vmem>>, vector<1x64x64xbf16>
    %20 = vector.shape_cast %19 : vector<1x64x64xbf16> to vector<64x64xbf16>
    %cst_16 = arith.constant dense<0.000000e+00> : vector<16x64xf32>
    %21 = tpu.matmul %18, %20, %cst_16 {dimension_numbers = #tpu.dot_dimension_numbers<[1], [0], [0], [1], [0, 0, 1, 1], [], []>} : vector<16x64xbf16>, vector<64x64xbf16>, vector<16x64xf32> -> vector<16x64xf32>
    %c1_17 = arith.constant 1 : index
    %c0_18 = arith.constant 0 : index
    %c0_19 = arith.constant 0 : index
    %22 = vector.load %arg5[%c1_17, %c0_18, %c0_19] : memref<3x1x64xf32, #tpu.memory_space<vmem>>, vector<1x1x64xf32>
    %23 = vector.shape_cast %22 : vector<1x1x64xf32> to vector<1x64xf32>
    %24 = vector.broadcast %23 : vector<1x64xf32> to vector<16x64xf32>
    %25 = arith.addf %21, %24 : vector<16x64xf32>
    %cst_20 = arith.constant 0.000000e+00 : f32
    %26 = vector.broadcast %cst_20 : f32 to vector<16x64xf32>
    %27 = arith.maximumf %25, %26 : vector<16x64xf32>
    %28 = arith.truncf %27 : vector<16x64xf32> to vector<16x64xbf16>
    %c2 = arith.constant 2 : index
    %c0_21 = arith.constant 0 : index
    %c0_22 = arith.constant 0 : index
    %29 = vector.load %arg4[%c2, %c0_21, %c0_22] : memref<3x64x64xbf16, #tpu.memory_space<vmem>>, vector<1x64x64xbf16>
    %30 = vector.shape_cast %29 : vector<1x64x64xbf16> to vector<64x64xbf16>
    %cst_23 = arith.constant dense<0.000000e+00> : vector<16x64xf32>
    %31 = tpu.matmul %28, %30, %cst_23 {dimension_numbers = #tpu.dot_dimension_numbers<[1], [0], [0], [1], [0, 0, 1, 1], [], []>} : vector<16x64xbf16>, vector<64x64xbf16>, vector<16x64xf32> -> vector<16x64xf32>
    %c2_24 = arith.constant 2 : index
    %c0_25 = arith.constant 0 : index
    %c0_26 = arith.constant 0 : index
    %32 = vector.load %arg5[%c2_24, %c0_25, %c0_26] : memref<3x1x64xf32, #tpu.memory_space<vmem>>, vector<1x1x64xf32>
    %33 = vector.shape_cast %32 : vector<1x1x64xf32> to vector<1x64xf32>
    %34 = vector.broadcast %33 : vector<1x64xf32> to vector<16x64xf32>
    %35 = arith.addf %31, %34 : vector<16x64xf32>
    %cst_27 = arith.constant 0.000000e+00 : f32
    %36 = vector.broadcast %cst_27 : f32 to vector<16x64xf32>
    %37 = arith.maximumf %35, %36 : vector<16x64xf32>
    %38 = arith.truncf %37 : vector<16x64xf32> to vector<16x64xbf16>
    %c0_28 = arith.constant 0 : index
    %c0_29 = arith.constant 0 : index
    %39 = vector.load %arg6[%c0_28, %c0_29] : memref<64x4xbf16, #tpu.memory_space<vmem>>, vector<64x4xbf16>
    %cst_30 = arith.constant dense<0.000000e+00> : vector<16x4xf32>
    %40 = tpu.matmul %38, %39, %cst_30 {dimension_numbers = #tpu.dot_dimension_numbers<[1], [0], [0], [1], [0, 0, 1, 1], [], []>} : vector<16x64xbf16>, vector<64x4xbf16>, vector<16x4xf32> -> vector<16x4xf32>
    %c0_31 = arith.constant 0 : index
    %c0_32 = arith.constant 0 : index
    %41 = vector.load %arg7[%c0_31, %c0_32] : memref<1x4xf32, #tpu.memory_space<vmem>>, vector<1x4xf32>
    %42 = vector.broadcast %41 : vector<1x4xf32> to vector<16x4xf32>
    %43 = arith.addf %40, %42 : vector<16x4xf32>
    %c0_33 = arith.constant 0 : index
    %c0_34 = arith.constant 0 : index
    %44 = vector.load %arg8[%c0_33, %c0_34] : memref<16x4xf32, #tpu.memory_space<vmem>>, vector<16x4xf32>
    tpu.vector_store %arg8[%c0_33, %c0_34], %43 {strides = array<i32>} : memref<16x4xf32, #tpu.memory_space<vmem>>, vector<16x4xf32>,
    return
  }
  func.func @transform_0(%arg0: i32) -> (i32, i32) {
    %c0_i32 = arith.constant 0 : i32
    %c0_i32_0 = arith.constant 0 : i32
    return %arg0, %c0_i32 : i32, i32
  }
  func.func @transform_1(%arg0: i32) -> (i32, i32) {
    %c0_i32 = arith.constant 0 : i32
    %c0_i32_0 = arith.constant 0 : i32
    %c0_i32_1 = arith.constant 0 : i32
    return %c0_i32, %c0_i32_0 : i32, i32
  }
  func.func @transform_2(%arg0: i32) -> (i32, i32) {
    %c0_i32 = arith.constant 0 : i32
    %c0_i32_0 = arith.constant 0 : i32
    %c0_i32_1 = arith.constant 0 : i32
    return %c0_i32, %c0_i32_0 : i32, i32
  }
  func.func @transform_3(%arg0: i32) -> (i32, i32, i32) {
    %c0_i32 = arith.constant 0 : i32
    %c0_i32_0 = arith.constant 0 : i32
    %c0_i32_1 = arith.constant 0 : i32
    %c0_i32_2 = arith.constant 0 : i32
    return %c0_i32, %c0_i32_0, %c0_i32_1 : i32, i32, i32
  }
  func.func @transform_4(%arg0: i32) -> (i32, i32, i32) {
    %c0_i32 = arith.constant 0 : i32
    %c0_i32_0 = arith.constant 0 : i32
    %c0_i32_1 = arith.constant 0 : i32
    %c0_i32_2 = arith.constant 0 : i32
    return %c0_i32, %c0_i32_0, %c0_i32_1 : i32, i32, i32
  }
  func.func @transform_5(%arg0: i32) -> (i32, i32) {
    %c0_i32 = arith.constant 0 : i32
    %c0_i32_0 = arith.constant 0 : i32
    %c0_i32_1 = arith.constant 0 : i32
    return %c0_i32, %c0_i32_0 : i32, i32
  }
  func.func @transform_6(%arg0: i32) -> (i32, i32) {
    %c0_i32 = arith.constant 0 : i32
    %c0_i32_0 = arith.constant 0 : i32
    %c0_i32_1 = arith.constant 0 : i32
    return %c0_i32, %c0_i32_0 : i32, i32
  }
  func.func @transform_7(%arg0: i32) -> (i32, i32) {
    %c0_i32 = arith.constant 0 : i32
    %c0_i32_0 = arith.constant 0 : i32
    return %arg0, %c0_i32 : i32, i32
  }
}

</mosaic_0001>

<bundles_post_ra>
// kernel: main_network_head_forward.1
= control target key start
LH: loop header
LB: loop body
LE: loop exit
PB: predicated region body
PF: predicated region fallthrough
CT: control target
= control target key end

     0   :  { %vm46_vm0 = vcmask 130048   ;;  %vm103_vm1 = vcmask 523264   ;;  %vm293_vm2 = vcmask 31744   ;;  %s537_s1 = inlined_call_operand.vmem [shape: bf16[16,64], index: 1, kind: input, shape index: {}]   ;;  %s538_s0 = inlined_call_operand.vmem [shape: bf16[16,16], index: 0, kind: input, shape index: {}]   ;;  %s539_s2 = inlined_call_operand.vmem [shape: f32[1,64], index: 2, kind: input, shape index: {}]   ;;  %s540_s4 = inlined_call_operand.vmem [shape: f32[3,1,64], index: 4, kind: input, shape index: {}]   ;;  %s541_s3 = inlined_call_operand.vmem [shape: bf16[3,64,64], index: 3, kind: input, shape index: {}]   ;;  %s542_s5 = inlined_call_operand.vmem [shape: bf16[64,4], index: 5, kind: input, shape index: {}]   ;;  %s543_s6 = inlined_call_operand.vmem [shape: f32[1,4], index: 6, kind: input, shape index: {}]   ;;  %s544_s7 = inlined_call_operand.vmem [shape: f32[16,4], index: 7, kind: output, shape index: {}]  }
   0x1   :  { %v396_v0 = vld [vmem:[%s537_s1] sm:$0xff]  ;;  %v400_v2 = vld [vmem:[%s541_s3 + $0x18] sm:$0xff]  ;;  %v399_v3 = vld [vmem:[%s541_s3 + $0x10] sm:$0xff] }
   0x2   :  { %v395_v1 = vld [vmem:[%s538_s0] sm:$0xff]  ;;  %57 = vmatpush.bf16.msra.mxu0 %v396_v0  ;;  %111 = vmatpush.bf16.msra.mxu1 %v400_v2  ;;  %v398_v4 = vld [vmem:[%s541_s3 + $0x8] sm:$0xff]  ;;  %v404_v14 = vld [vmem:[%s541_s3 + $0x38] sm:$0xff] }
   0x3   :  { %v397_v5 = vld [vmem:[%s541_s3] sm:$0xff]  ;;  %169 = vmatpush.bf16.msra.mxu2 %v404_v14  ;;  %v403_v15 = vld [vmem:[%s541_s3 + $0x30] sm:$0xff]  ;;  %v402_v16 = vld [vmem:[%s541_s3 + $0x28] sm:$0xff] }
   0x4   :  { %v413_v7 = vld [vmem:[%s539_s2] ss:$0 sm:$0xff]  ;;  %v408_v26 = vld [vmem:[%s541_s3 + $0x58] sm:$0xff]  ;;  %v407_v27 = vld [vmem:[%s541_s3 + $0x50] sm:$0xff] }
   0x5   :  { %308 = vmatmul.msk.bf16.vlgmr.msra.gmra.mxu0 %vm46_vm0, %v395_v1  ;;  %v401_v17 = vld [vmem:[%s541_s3 + $0x20] sm:$0xff]  ;;  %227 = vmatpush.bf16.msra.mxu3 %v408_v26  ;;  %v406_v28 = vld [vmem:[%s541_s3 + $0x48] sm:$0xff]  ;;  %v412_v30 = vld [vmem:[%s542_s5 + $0x18] sm:$0xff] }
   0x6   :  { %112 = vmatpush.bf16.msra.mxu1 %v399_v3  ;;  %v414_v19 = vld [vmem:[%s540_s4] ss:$0 sm:$0xff]  ;;  %283 = vmatpush.bf16.msrb.mxu0 %v412_v30  ;;  %v415_v32 = vld [vmem:[%s540_s4 + $0x1] ss:$0 sm:$0xff]  ;;  %v411_v39 = vld [vmem:[%s542_s5 + $0x10] sm:$0xff] }
   0x7   :  { %170 = vmatpush.bf16.msra.mxu2 %v403_v15  ;;  %v405_v29 = vld [vmem:[%s541_s3 + $0x40] sm:$0xff]  ;;  %v410_v40 = vld [vmem:[%s542_s5 + $0x8] sm:$0xff] }
   0x8   :  { %v409_v41 = vld [vmem:[%s542_s5] sm:$0xff] }
   0x9   :  { %228 = vmatpush.bf16.msra.mxu3 %v407_v27  ;;  %v416_v43 = vld [vmem:[%s540_s4 + $0x2] ss:$0 sm:$0xff]  ;;  %v417_v50 = vld [vmem:[%s543_s6] ss:$0 sm:$0xff] }
   0xa   :  { %113 = vmatpush.bf16.msra.mxu1 %v398_v4  ;;  %284 = vmatpush.bf16.msrb.mxu0 %v411_v39 }
   0xb   :  { %171 = vmatpush.bf16.msra.mxu2 %v402_v16 }
   0xd   :  { %229 = vmatpush.bf16.msra.mxu3 %v406_v28 }
   0xe   :  { %114 = vmatpush.bf16.msra.mxu1 %v397_v5  ;;  %285 = vmatpush.bf16.msrb.mxu0 %v410_v40 }
   0xf   :  { %172 = vmatpush.bf16.msra.mxu2 %v401_v17 }
  0x11   :  { %230 = vmatpush.bf16.msra.mxu3 %v405_v29 }
  0x12   :  { %286 = vmatpush.bf16.msrb.mxu0 %v409_v41 }
  0x82   :  { %v59_v6 = vpop.f32.mrf.mxu0 }
  0x83   :  { %v60_v8 = vadd.f32 %v413_v7, %v59_v6 }
  0x85   :  { %v64_v11 = vmax.f32 %v60_v8, 0.0 }
  0x8a   :  { %v61_v9 = vpop.f32.mrf.mxu0 }
  0x8b   :  { %v62_v10 = vadd.f32 %v413_v7, %v61_v9 }
  0x8d   :  { %v65_v12 = vmax.f32 %v62_v10, 0.0 }
  0x8f   :  { %v66_v13 = vpack.c.bf16 %v65_v12, %v64_v11 }
  0x91   :  { %325 = vmatmul.msk.bf16.vlgmr.msra.gmra.mxu1 %vm103_vm1, %v66_v13 }
 0x10e   :  { %v116_v18 = vpop.f32.mrf.mxu1 }
 0x10f   :  { %v117_v20 = vadd.f32 %v414_v19, %v116_v18 }
 0x111   :  { %v121_v23 = vmax.f32 %v117_v20, 0.0 }
 0x116   :  { %v118_v21 = vpop.f32.mrf.mxu1 }
 0x117   :  { %v119_v22 = vadd.f32 %v414_v19, %v118_v21 }
 0x119   :  { %v122_v24 = vmax.f32 %v119_v22, 0.0 }
 0x11b   :  { %v123_v25 = vpack.c.bf16 %v122_v24, %v121_v23 }
 0x11d   :  { %351 = vmatmul.msk.bf16.vlgmr.msra.gmra.mxu2 %vm103_vm1, %v123_v25 }
 0x1a0   :  { %v174_v31 = vpop.f32.mrf.mxu2 }
 0x1a1   :  { %v175_v33 = vadd.f32 %v415_v32, %v174_v31 }
 0x1a3   :  { %v179_v36 = vmax.f32 %v175_v33, 0.0 }
 0x1a8   :  { %v176_v34 = vpop.f32.mrf.mxu2 }
 0x1a9   :  { %v177_v35 = vadd.f32 %v415_v32, %v176_v34 }
 0x1ab   :  { %v180_v37 = vmax.f32 %v177_v35, 0.0 }
 0x1ad   :  { %v181_v38 = vpack.c.bf16 %v180_v37, %v179_v36 }
 0x1af   :  { %377 = vmatmul.msk.bf16.vlgmr.msra.gmra.mxu3 %vm103_vm1, %v181_v38 }
 0x232   :  { %v232_v42 = vpop.f32.mrf.mxu3 }
 0x233   :  { %v233_v44 = vadd.f32 %v416_v43, %v232_v42 }
 0x235   :  { %v237_v47 = vmax.f32 %v233_v44, 0.0 }
 0x23a   :  { %v234_v45 = vpop.f32.mrf.mxu3 }
 0x23b   :  { %v235_v46 = vadd.f32 %v416_v43, %v234_v45 }
 0x23d   :  { %v238_v48 = vmax.f32 %v235_v46, 0.0 }
 0x23f   :  { %v239_v49 = vpack.c.bf16 %v238_v48, %v237_v47 }
 0x241   :  { %394 = vmatmul.msk.bf16.vlgmr.msrb.gmra.mxu0 %vm103_vm1, %v239_v49 }
 0x2be   :  { %v288_v51 = vpop.f32.mrf.mxu0 }
 0x2bf   :  { %v289_v52 = vadd.f32 %v417_v50, %v288_v51 }
 0x2c1   :  { %294 = vst.msk [vmem:[%s544_s7] sm:$0xff] %vm293_vm2, %v289_v52 }
 0x2c6   :  { %v290_v53 = vpop.f32.mrf.mxu0 }
 0x2c7   :  { %v291_v54 = vadd.f32 %v417_v50, %v290_v53 }
 0x2c9   :  { %295 = vst.msk [vmem:[%s544_s7 + $0x8] sm:$0xff] %vm293_vm2, %v291_v54 }

</bundles_post_ra>
